<compile_context>
chip_gen: v6e
topology: v6e:2x2x1
jax: 0.10.0
libtpu: 0.0.40
codegen_flags: <defaults>
</compile_context>

<pallas_src>
import jax
import jax.numpy as jnp
import numpy as np
from jax.experimental import pallas as pl
from jax.experimental.pallas import tpu as pltpu


def _round_up(x, m):
    return ((x + m - 1) // m) * m


def _vmem_limit_bytes():
    """Generation-aware scoped-VMEM hint with a safe fallback."""
    try:
        cap = pltpu.get_tpu_info().vmem_capacity_bytes
        return int(min(cap // 2, 96 * 1024 * 1024))
    except Exception:
        return 32 * 1024 * 1024


# ---------------------------------------------------------------------------
# Phase 1: K-tiled conv matmul + per-channel sum / sum-of-squares partials
# ---------------------------------------------------------------------------
def _conv_stats_kernel(p_ref, w_ref, y_ref, sum_ref, ssq_ref, acc_ref):
    # p_ref:   [TM, TK]     im2col patch tile (mxu dtype)
    # w_ref:   [TK, CP]     conv weight tile  (mxu dtype)
    # y_ref:   [TM, CP]     conv output tile  (store dtype)
    # sum_ref: [8, CP]      per-core sublane-phase partial sums (f32)
    # ssq_ref: [8, CP]      per-core sublane-phase partial sums of squares
    # acc_ref: [TM, CP]     f32 accumulator scratch, resident across K axis
    k = pl.program_id(2)

    @pl.when(k == 0)
    def _():
        acc_ref[...] = jnp.zeros_like(acc_ref)

    acc_ref[...] += jnp.dot(p_ref[...], w_ref[...],
                            preferred_element_type=jnp.float32)

    # Zero the per-core stat partials once, at the start of this core's sweep.
    @pl.when(jnp.logical_and(pl.program_id(1) == 0, k == 0))
    def _():
        sum_ref[...] = jnp.zeros_like(sum_ref)
        ssq_ref[...] = jnp.zeros_like(ssq_ref)

    @pl.when(k == pl.num_programs(2) - 1)
    def _():
        y = acc_ref[...]                                   # exact f32
        y_ref[...] = y.astype(y_ref.dtype)
        tm, cp = y.shape
        yg = y.reshape(tm // 8, 8, cp)                     # sublane-phase groups
        # Zero-padded patch rows produce y == 0, so they do not perturb the
        # sums; the wrapper divides by the true M.
        sum_ref[...] += jnp.sum(yg, axis=0)
        ssq_ref[...] += jnp.sum(yg * yg, axis=0)


# ---------------------------------------------------------------------------
# Phase 2: folded BatchNorm affine (scale/shift) + SiLU (exact sigmoid)
# ---------------------------------------------------------------------------
def _bn_silu_kernel(y_ref, scale_ref, shift_ref, o_ref):
    z = y_ref[...].astype(jnp.float32) * scale_ref[...] + shift_ref[...]
    # Exact sigmoid: this phase is HBM-bound, so the exact divide is hidden
    # under the memory stream (the approx reciprocal previously cost ~3.5e-3
    # relative error and failed the parity check).
    sig = 1.0 / (1.0 + jnp.exp(-z))
    o_ref[...] = (z * sig).astype(o_ref.dtype)


# ---------------------------------------------------------------------------
# Glue: im2col patch extraction (layout only, no arithmetic)
# ---------------------------------------------------------------------------
def _im2col(x_nhwc, ksize, stride, pad):
    N, H, W, C = x_nhwc.shape
    xp = jnp.pad(x_nhwc, ((0, 0), (pad, pad), (pad, pad), (0, 0)))
    H_out = (H + 2 * pad - ksize) // stride + 1
    W_out = (W + 2 * pad - ksize) // stride + 1
    cols = []
    for kh in range(ksize):
        for kw in range(ksize):
            cols.append(
                xp[:, kh:kh + stride * H_out:stride, kw:kw + stride * W_out:stride, :]
            )
    patches = jnp.concatenate(cols, axis=-1)            # [N, H_out, W_out, k*k*C]
    return patches.reshape(N * H_out * W_out, ksize * ksize * C), (N, H_out, W_out)


# ---------------------------------------------------------------------------
# Wrapper: BaseConv.forward (Conv2d(bias=False) -> BatchNorm2d(train) -> SiLU)
# ---------------------------------------------------------------------------
def base_conv_forward(x_nchw, conv_w, bn_gamma, bn_beta, ksize, stride,
                      *, tile_m=1024, tile_k=512,
                      mxu_dtype=jnp.bfloat16, eps=1e-5):
    """x_nchw: [N, C_in, H, W]; conv_w: [C_out, C_in, k, k] (PyTorch layout)."""
    pad = (ksize - 1) // 2
    C_out = conv_w.shape[0]
    vmem_limit = _vmem_limit_bytes()

    x_nhwc = jnp.transpose(x_nchw, (0, 2, 3, 1)).astype(jnp.float32)
    patches, (N, H_out, W_out) = _im2col(x_nhwc, ksize, stride, pad)
    M, K = patches.shape

    # --- tiling / padding ---------------------------------------------------
    CP = _round_up(C_out, 128)                      # lane-dense output channels
    TK = min(tile_k, _round_up(K, 128))             # lane-dense contraction tile
    K_pad = _round_up(K, TK)
    grid_k = K_pad // TK

    TM = min(tile_m, _round_up(M, 8))
    M_pad = _round_up(M, TM)
    grid_m = M_pad // TM
    # Outer "parallel" axis -> shards phase 1 across the 2 TensorCores on v7x.
    NC = 2 if grid_m >= 2 else 1
    gm_pc = pl.cdiv(grid_m, NC)
    M_pad = NC * gm_pc * TM
    grid_m = M_pad // TM

    store_dtype = jnp.float32 if mxu_dtype == jnp.float32 else jnp.bfloat16

    patches = jnp.pad(patches, ((0, M_pad - M), (0, K_pad - K))).astype(mxu_dtype)

    # [C_out, C_in, kh, kw] -> [kh, kw, c_in, C_out] -> [K, C_out] -> [K_pad, CP]
    # (matches patch tap ordering: kh, kw, c_in)
    w_mat = jnp.transpose(conv_w, (2, 3, 1, 0)).reshape(K, C_out)
    w_mat = jnp.pad(w_mat.astype(jnp.float32),
                    ((0, K_pad - K), (0, CP - C_out))).astype(mxu_dtype)

    itemsize = jnp.dtype(mxu_dtype).itemsize
    store_itemsize = jnp.dtype(store_dtype).itemsize
    cost1 = pl.CostEstimate(
        flops=2 * M_pad * K_pad * CP,
        transcendentals=0,
        bytes_accessed=(M_pad * K_pad * itemsize + grid_m * K_pad * CP * itemsize
                        + M_pad * CP * store_itemsize + 2 * NC * 8 * CP * 4),
    )

    y_flat, part_sum, part_ssq = pl.pallas_call(
        _conv_stats_kernel,
        out_shape=(
            jax.ShapeDtypeStruct((M_pad, CP), store_dtype),
            jax.ShapeDtypeStruct((NC * 8, CP), jnp.float32),
            jax.ShapeDtypeStruct((NC * 8, CP), jnp.float32),
        ),
        grid=(NC, gm_pc, grid_k),
        in_specs=[
            pl.BlockSpec((TM, TK), lambda c, i, k: (c * gm_pc + i, k)),
            pl.BlockSpec((TK, CP), lambda c, i, k: (k, 0)),
        ],
        out_specs=(
            pl.BlockSpec((TM, CP), lambda c, i, k: (c * gm_pc + i, 0)),
            pl.BlockSpec((8, CP), lambda c, i, k: (c, 0)),
            pl.BlockSpec((8, CP), lambda c, i, k: (c, 0)),
        ),
        scratch_shapes=[pltpu.VMEM((TM, CP), jnp.float32)],
        compiler_params=pltpu.CompilerParams(
            # outer axis: independent per-core partials -> parallel;
            # M / K axes carry resident accumulators -> arbitrary.
            dimension_semantics=("parallel", "arbitrary", "arbitrary"),
            vmem_limit_bytes=vmem_limit,
        ),
        cost_estimate=cost1,
    )(patches, w_mat)

    # Fold BN (training-mode batch statistics, biased variance) into a single
    # per-channel scale/shift. Tiny [*, CP] math; stays in XLA.
    ch_sum = jnp.sum(part_sum, axis=0, keepdims=True)
    ch_ssq = jnp.sum(part_ssq, axis=0, keepdims=True)
    mean = ch_sum / float(M)
    var = jnp.maximum(ch_ssq / float(M) - mean * mean, 0.0)
    inv = jax.lax.rsqrt(var + eps)
    gamma = jnp.pad(bn_gamma.reshape(1, C_out).astype(jnp.float32),
                    ((0, 0), (0, CP - C_out)))
    beta = jnp.pad(bn_beta.reshape(1, C_out).astype(jnp.float32),
                   ((0, 0), (0, CP - C_out)))
    scale = gamma * inv
    shift = beta - mean * scale

    cost2 = pl.CostEstimate(
        flops=6 * M_pad * CP,
        transcendentals=M_pad * CP,
        bytes_accessed=M_pad * CP * (store_itemsize + 4) + 2 * CP * 4,
    )

    out_flat = pl.pallas_call(
        _bn_silu_kernel,
        out_shape=jax.ShapeDtypeStruct((M_pad, CP), jnp.float32),
        grid=(grid_m,),
        in_specs=[
            pl.BlockSpec((TM, CP), lambda i: (i, 0)),
            pl.BlockSpec((1, CP), lambda i: (0, 0)),
            pl.BlockSpec((1, CP), lambda i: (0, 0)),
        ],
        out_specs=pl.BlockSpec((TM, CP), lambda i: (i, 0)),
        compiler_params=pltpu.CompilerParams(
            # Independent tiles -> shards across TensorCores on v7x.
            dimension_semantics=("parallel",),
            vmem_limit_bytes=vmem_limit,
        ),
        cost_estimate=cost2,
    )(y_flat, scale, shift)

    out_nhwc = out_flat[:M, :C_out].reshape(N, H_out, W_out, C_out)
    return jnp.transpose(out_nhwc, (0, 3, 1, 2))          # back to NCHW


# ---------------------------------------------------------------------------
# Pure-JAX reference (for a sanity check)
# ---------------------------------------------------------------------------
def base_conv_reference(x_nchw, conv_w, bn_gamma, bn_beta, ksize, stride):
    pad = (ksize - 1) // 2
    y = jax.lax.conv_general_dilated(
        x_nchw.astype(jnp.float32), conv_w.astype(jnp.float32),
        window_strides=(stride, stride),
        padding=[(pad, pad), (pad, pad)],
        dimension_numbers=("NCHW", "OIHW", "NCHW"),
    )
    mean = jnp.mean(y, axis=(0, 2, 3), keepdims=True)
    var = jnp.mean((y - mean) ** 2, axis=(0, 2, 3), keepdims=True)
    y = (y - mean) * jax.lax.rsqrt(var + 1e-5)
    y = y * bn_gamma.reshape(1, -1, 1, 1) + bn_beta.reshape(1, -1, 1, 1)
    return y * jax.nn.sigmoid(y)


if __name__ == "__main__":
    # Module config: BaseConv(in_channels=4, out_channels=8, ksize=3, stride=1)
    N, C_in, H, W = 2, 4, 16, 16
    C_out, ksize, stride = 8, 3, 1

    key = jax.random.PRNGKey(0)
    k_x, k_w = jax.random.split(key)

    x = jax.random.normal(k_x, (N, C_in, H, W), dtype=jnp.float32)
    # Conv2d weight [C_out, C_in, k, k]; deterministic init (kaiming-uniform-like scale)
    fan_in = C_in * ksize * ksize
    bound = 1.0 / np.sqrt(fan_in)
    conv_w = jax.random.uniform(k_w, (C_out, C_in, ksize, ksize),
                                minval=-bound, maxval=bound, dtype=jnp.float32)
    # BatchNorm2d default init: gamma=1, beta=0
    bn_gamma = jnp.ones((C_out,), dtype=jnp.float32)
    bn_beta = jnp.zeros((C_out,), dtype=jnp.float32)

    ref = jax.block_until_ready(
        base_conv_reference(x, conv_w, bn_gamma, bn_beta, ksize, stride))

    # Tight parity check on the exact f32 MXU path (sigmoid is exact now).
    out_f32 = jax.block_until_ready(
        base_conv_forward(x, conv_w, bn_gamma, bn_beta, ksize, stride,
                          mxu_dtype=jnp.float32))
    np.testing.assert_allclose(np.asarray(out_f32), np.asarray(ref),
                               rtol=1e-3, atol=1e-3)

    # Fast path (bf16 MXU operands + bf16 intermediate) - loose tolerance.
    out_bf16 = jax.block_until_ready(
        base_conv_forward(x, conv_w, bn_gamma, bn_beta, ksize, stride))
    np.testing.assert_allclose(np.asarray(out_bf16), np.asarray(ref),
                               rtol=1e-1, atol=1e-1)

    print("KERNEL_OK")
</pallas_src>

<mosaic_0001>
module attributes {stable_mosaic.version = 11 : i64} {
  func.func @_conv_stats_kernel(%arg0: i32, %arg1: i32, %arg2: i32, %arg3: memref<512x128xf32, #tpu.memory_space<vmem>>, %arg4: memref<128x128xf32, #tpu.memory_space<vmem>>, %arg5: memref<512x128xf32, #tpu.memory_space<vmem>>, %arg6: memref<8x128xf32, #tpu.memory_space<vmem>>, %arg7: memref<8x128xf32, #tpu.memory_space<vmem>>, %arg8: memref<512x128xf32, #tpu.memory_space<vmem>>) attributes {dimension_semantics = [#tpu.dimension_semantics<parallel>, #tpu.dimension_semantics<arbitrary>, #tpu.dimension_semantics<arbitrary>], iteration_bounds = array<i64: 1, 1, 1>, scalar_prefetch = 0 : i64, scratch_operands = 1 : i64, tpu.core_type = #tpu.core_type<tc>, window_params = [{transform_indices = @transform_0, window_bounds = array<i64: 512, 128>}, {transform_indices = @transform_1, window_bounds = array<i64: 128, 128>}, {transform_indices = @transform_2, window_bounds = array<i64: 512, 128>}, {transform_indices = @transform_3, window_bounds = array<i64: 8, 128>}, {transform_indices = @transform_4, window_bounds = array<i64: 8, 128>}]} {
    %c0_i32 = arith.constant 0 : i32
    %0 = arith.cmpi eq, %arg2, %c0_i32 : i32
    %1 = arith.extui %0 : i1 to i32
    %c0_i32_0 = arith.constant 0 : i32
    %2 = arith.cmpi ne, %1, %c0_i32_0 : i32
    scf.if %2 {
      %cst_13 = arith.constant 0.000000e+00 : f32
      %17 = vector.broadcast %cst_13 : f32 to vector<512x128xf32>
      %c0_14 = arith.constant 0 : index
      %c0_15 = arith.constant 0 : index
      %18 = vector.load %arg8[%c0_14, %c0_15] : memref<512x128xf32, #tpu.memory_space<vmem>>, vector<512x128xf32>
      tpu.vector_store %arg8[%c0_14, %c0_15], %17 {strides = array<i32>} : memref<512x128xf32, #tpu.memory_space<vmem>>, vector<512x128xf32>,
    } else {
    }
    %c0 = arith.constant 0 : index
    %c0_1 = arith.constant 0 : index
    %3 = vector.load %arg8[%c0, %c0_1] : memref<512x128xf32, #tpu.memory_space<vmem>>, vector<512x128xf32>
    %c0_2 = arith.constant 0 : index
    %c0_3 = arith.constant 0 : index
    %4 = vector.load %arg3[%c0_2, %c0_3] : memref<512x128xf32, #tpu.memory_space<vmem>>, vector<512x128xf32>
    %c0_4 = arith.constant 0 : index
    %c0_5 = arith.constant 0 : index
    %5 = vector.load %arg4[%c0_4, %c0_5] : memref<128x128xf32, #tpu.memory_space<vmem>>, vector<128x128xf32>
    %cst = arith.constant dense<0.000000e+00> : vector<512x128xf32>
    %6 = tpu.matmul %4, %5, %cst {dimension_numbers = #tpu.dot_dimension_numbers<[1], [0], [0], [1], [0, 0, 1, 1], [], []>} : vector<512x128xf32>, vector<128x128xf32>, vector<512x128xf32> -> vector<512x128xf32>
    %7 = arith.addf %3, %6 : vector<512x128xf32>
    %c0_6 = arith.constant 0 : index
    %c0_7 = arith.constant 0 : index
    %8 = vector.load %arg8[%c0_6, %c0_7] : memref<512x128xf32, #tpu.memory_space<vmem>>, vector<512x128xf32>
    tpu.vector_store %arg8[%c0_6, %c0_7], %7 {strides = array<i32>} : memref<512x128xf32, #tpu.memory_space<vmem>>, vector<512x128xf32>,
    %c0_i32_8 = arith.constant 0 : i32
    %9 = arith.cmpi eq, %arg1, %c0_i32_8 : i32
    %c0_i32_9 = arith.constant 0 : i32
    %10 = arith.cmpi eq, %arg2, %c0_i32_9 : i32
    %11 = arith.andi %9, %10 : i1
    %12 = arith.extui %11 : i1 to i32
    %c0_i32_10 = arith.constant 0 : i32
    %13 = arith.cmpi ne, %12, %c0_i32_10 : i32
    scf.if %13 {
      %cst_13 = arith.constant 0.000000e+00 : f32
      %17 = vector.broadcast %cst_13 : f32 to vector<8x128xf32>
      %c0_14 = arith.constant 0 : index
      %c0_15 = arith.constant 0 : index
      %18 = vector.load %arg6[%c0_14, %c0_15] : memref<8x128xf32, #tpu.memory_space<vmem>>, vector<8x128xf32>
      tpu.vector_store %arg6[%c0_14, %c0_15], %17 {strides = array<i32>} : memref<8x128xf32, #tpu.memory_space<vmem>>, vector<8x128xf32>,
      %cst_16 = arith.constant 0.000000e+00 : f32
      %19 = vector.broadcast %cst_16 : f32 to vector<8x128xf32>
      %c0_17 = arith.constant 0 : index
      %c0_18 = arith.constant 0 : index
      %20 = vector.load %arg7[%c0_17, %c0_18] : memref<8x128xf32, #tpu.memory_space<vmem>>, vector<8x128xf32>
      tpu.vector_store %arg7[%c0_17, %c0_18], %19 {strides = array<i32>} : memref<8x128xf32, #tpu.memory_space<vmem>>, vector<8x128xf32>,
    } else {
    }
    %c0_i32_11 = arith.constant 0 : i32
    %14 = arith.cmpi eq, %arg2, %c0_i32_11 : i32
    %15 = arith.extui %14 : i1 to i32
    %c0_i32_12 = arith.constant 0 : i32
    %16 = arith.cmpi ne, %15, %c0_i32_12 : i32
    scf.if %16 {
      %c0_13 = arith.constant 0 : index
      %c0_14 = arith.constant 0 : index
      %17 = vector.load %arg8[%c0_13, %c0_14] : memref<512x128xf32, #tpu.memory_space<vmem>>, vector<512x128xf32>
      %c0_15 = arith.constant 0 : index
      %c0_16 = arith.constant 0 : index
      %18 = vector.load %arg5[%c0_15, %c0_16] : memref<512x128xf32, #tpu.memory_space<vmem>>, vector<512x128xf32>
      tpu.vector_store %arg5[%c0_15, %c0_16], %17 {strides = array<i32>} : memref<512x128xf32, #tpu.memory_space<vmem>>, vector<512x128xf32>,
      %19 = vector.shape_cast %17 : vector<512x128xf32> to vector<64x8x128xf32>
      %c0_17 = arith.constant 0 : index
      %c0_18 = arith.constant 0 : index
      %20 = vector.load %arg6[%c0_17, %c0_18] : memref<8x128xf32, #tpu.memory_space<vmem>>, vector<8x128xf32>
      %cst_19 = arith.constant dense<0.000000e+00> : vector<8x128xf32>
      %21 = vector.multi_reduction <add>, %19, %cst_19 [0] : vector<64x8x128xf32> to vector<8x128xf32>
      %22 = arith.addf %20, %21 : vector<8x128xf32>
      %c0_20 = arith.constant 0 : index
      %c0_21 = arith.constant 0 : index
      %23 = vector.load %arg6[%c0_20, %c0_21] : memref<8x128xf32, #tpu.memory_space<vmem>>, vector<8x128xf32>
      tpu.vector_store %arg6[%c0_20, %c0_21], %22 {strides = array<i32>} : memref<8x128xf32, #tpu.memory_space<vmem>>, vector<8x128xf32>,
      %c0_22 = arith.constant 0 : index
      %c0_23 = arith.constant 0 : index
      %24 = vector.load %arg7[%c0_22, %c0_23] : memref<8x128xf32, #tpu.memory_space<vmem>>, vector<8x128xf32>
      %25 = arith.mulf %19, %19 : vector<64x8x128xf32>
      %cst_24 = arith.constant dense<0.000000e+00> : vector<8x128xf32>
      %26 = vector.multi_reduction <add>, %25, %cst_24 [0] : vector<64x8x128xf32> to vector<8x128xf32>
      %27 = arith.addf %24, %26 : vector<8x128xf32>
      %c0_25 = arith.constant 0 : index
      %c0_26 = arith.constant 0 : index
      %28 = vector.load %arg7[%c0_25, %c0_26] : memref<8x128xf32, #tpu.memory_space<vmem>>, vector<8x128xf32>
      tpu.vector_store %arg7[%c0_25, %c0_26], %27 {strides = array<i32>} : memref<8x128xf32, #tpu.memory_space<vmem>>, vector<8x128xf32>,
    } else {
    }
    return
  }
  func.func @transform_0(%arg0: i32, %arg1: i32, %arg2: i32) -> (i32, i32) {
    %c1_i32 = arith.constant 1 : i32
    %0 = arith.muli %arg0, %c1_i32 : i32
    %1 = arith.addi %0, %arg1 : i32
    %c0_i32 = arith.constant 0 : i32
    return %1, %arg2 : i32, i32
  }
  func.func @transform_1(%arg0: i32, %arg1: i32, %arg2: i32) -> (i32, i32) {
    %c0_i32 = arith.constant 0 : i32
    %c0_i32_0 = arith.constant 0 : i32
    return %arg2, %c0_i32 : i32, i32
  }
  func.func @transform_2(%arg0: i32, %arg1: i32, %arg2: i32) -> (i32, i32) {
    %c1_i32 = arith.constant 1 : i32
    %0 = arith.muli %arg0, %c1_i32 : i32
    %1 = arith.addi %0, %arg1 : i32
    %c0_i32 = arith.constant 0 : i32
    %c0_i32_0 = arith.constant 0 : i32
    return %1, %c0_i32 : i32, i32
  }
  func.func @transform_3(%arg0: i32, %arg1: i32, %arg2: i32) -> (i32, i32) {
    %c0_i32 = arith.constant 0 : i32
    %c0_i32_0 = arith.constant 0 : i32
    return %arg0, %c0_i32 : i32, i32
  }
  func.func @transform_4(%arg0: i32, %arg1: i32, %arg2: i32) -> (i32, i32) {
    %c0_i32 = arith.constant 0 : i32
    %c0_i32_0 = arith.constant 0 : i32
    return %arg0, %c0_i32 : i32, i32
  }
}

</mosaic_0001>

<bundles_post_ra>
// kernel: tpu_custom_call.1
= control target key start
LH: loop header
LB: loop body
LE: loop exit
PB: predicated region body
PF: predicated region fallthrough
CT: control target
= control target key end

     0   :  { %10 = vsyncpa [#allocation4], 0  ;;  %s1764_s0 = inlined_call_operand.hbm [shape: f32[512,128], index: 0, kind: input, shape index: {}]   ;;  %s1765_s1 = inlined_call_operand.hbm [shape: f32[128,128], index: 1, kind: input, shape index: {}]   ;;  %s1766_s2 = inlined_call_operand.hbm [shape: f32[512,128], index: 2, kind: output, shape index: {0}]   ;;  %s1767_s3 = inlined_call_operand.hbm [shape: f32[8,128], index: 3, kind: output, shape index: {1}]   ;;  %s1768_s4 = inlined_call_operand.hbm [shape: f32[8,128], index: 4, kind: output, shape index: {2}]  }
   0x1   :  { %11 = vsyncpa [#allocation7], 0 }
   0x2   :  { %12 = vsyncpa [#allocation5], 0 }
   0x3   :  { %13 = vsyncpa [#allocation10], 0  ;;  %s1516_s15 = smov [#allocation3]  }
   0x4   :  { %s23_s16 = sshll.u32 %s1516_s15, 4  ;;  %s24_s16 = int_to_ptr.vmem [resolvable:$true] %s23_s16 }
   0x5   :  { %s1416_s17 = scalar_lea.vmem %s24_s16, 8192  ;;  %p1421_p1 = scmp.lt.s32.totalorder %s24_s16, %s24_s16 }
   0x6   :  { %p1417_p0 = scmp.ne.s32.totalorder %s24_s16, %s1416_s17  ;;  %p1422_p2 = scmp.lt.s32.totalorder %s1416_s17, %s1416_s17 }
   0x8   :  { %p1423_p3 = por %p1422_p2, %p1421_p1 }
   0xa   :  { %p1424_p4 = pnand %p1423_p3, %p1417_p0 }
   0xc   :  { %1427 = shalt.err (!%p1424_p4)
}
   0xd   :  { %s1517_s18 = smov 128   ;;  %s1518_s19 = smov 8  }
   0xe   :  { %29 = dma.hbm_to_vmem [thread:$0]  %s1764_s0, 8192, %s24_s16, [#allocation4], %s1517_s18, %s1517_s18, %s1518_s19  }
   0xf   :  { %s1519_s22 = smov [#allocation6]  }
  0x10   :  { %s35_s23 = sshll.u32 %s1519_s22, 4  ;;  %s36_s23 = int_to_ptr.vmem [resolvable:$true] %s35_s23 }
  0x11   :  { %s1436_s24 = scalar_lea.vmem %s36_s23, 2048  ;;  %p1441_p6 = scmp.lt.s32.totalorder %s36_s23, %s36_s23 }
  0x12   :  { %p1437_p5 = scmp.ne.s32.totalorder %s36_s23, %s1436_s24  ;;  %p1442_p7 = scmp.lt.s32.totalorder %s1436_s24, %s1436_s24 }
  0x14   :  { %p1443_p8 = por %p1442_p7, %p1441_p6 }
  0x16   :  { %p1444_p9 = pnand %p1443_p8, %p1437_p5 }
  0x18   :  { %1447 = shalt.err (!%p1444_p9)
}
  0x19   :  { %41 = dma.hbm_to_vmem [thread:$0]  %s1765_s1, 2048, %s36_s23, [#allocation7], %s1517_s18, %s1517_s18, %s1518_s19  }
  0x1a   :  { %1508 = dma.done.wait [#allocation4], 8192  }
  0x1b   :  { %1509 = vsyncadd [#allocation4], 4294959104 }
  0x1c   :  { %1510 = dma.done.wait [#allocation7], 2048  }
  0x1d   :  { %1511 = vsyncadd [#allocation7], 4294965248  ;;  %v263_v0 = vld [vmem:[#allocation6 + $0x78] sm:$0xff]  ;;  %v262_v1 = vld [vmem:[#allocation6 + $0x70] sm:$0xff]  ;;  %s1520_s0 = smov [#allocation8]  }
  0x1e   :  { %1240 = vmatprep.subr.mxu0 %v263_v0  ;;  %1368 = vmatprep.subr.mxu1 %v263_v0  ;;  %v261_v2 = vld [vmem:[#allocation6 + $0x68] sm:$0xff]  ;;  %v260_v3 = vld [vmem:[#allocation6 + $0x60] sm:$0xff]  ;;  %v259_v5 = vld [vmem:[#allocation6 + $0x58] sm:$0xff]  ;;  %s1120_s1 = sshll.u32 %s1520_s0, 4  ;;  %s1121_s1 = int_to_ptr.vmem [resolvable:$true] %s1120_s1 }
  0x1f   :  { %1241 = vmatpush3.msra.mxu0 %v263_v0  ;;  %1384 = vmatpush3.msra.mxu1 %v263_v0  ;;  %v184_v4 = vld [vmem:[#allocation3] sm:$0xff]  ;;  %v258_v6 = vld [vmem:[#allocation6 + $0x50] sm:$0xff]  ;;  %v257_v7 = vld [vmem:[#allocation6 + $0x48] sm:$0xff]  ;;  %s1448_s27 = scalar_lea.vmem %s1121_s1, 8192  ;;  %p1453_p11 = scmp.lt.s32.totalorder %s1121_s1, %s1121_s1 }
  0x20   :  { %1242 = vmatprep.subr.mxu0 %v262_v1  ;;  %1369 = vmatprep.subr.mxu1 %v262_v1  ;;  %v256_v8 = vld [vmem:[#allocation6 + $0x40] sm:$0xff]  ;;  %v255_v9 = vld [vmem:[#allocation6 + $0x38] sm:$0xff]  ;;  %v254_v10 = vld [vmem:[#allocation6 + $0x30] sm:$0xff]  ;;  %p1449_p10 = scmp.ne.s32.totalorder %s1121_s1, %s1448_s27  ;;  %p1454_p12 = scmp.lt.s32.totalorder %s1448_s27, %s1448_s27 }
  0x21   :  { %1243 = vmatpush3.msra.mxu0 %v262_v1  ;;  %1385 = vmatpush3.msra.mxu1 %v262_v1  ;;  %v253_v11 = vld [vmem:[#allocation6 + $0x28] sm:$0xff]  ;;  %v252_v12 = vld [vmem:[#allocation6 + $0x20] sm:$0xff]  ;;  %v251_v13 = vld [vmem:[#allocation6 + $0x18] sm:$0xff] }
  0x22   :  { %1244 = vmatprep.subr.mxu0 %v261_v2  ;;  %1370 = vmatprep.subr.mxu1 %v261_v2  ;;  %v250_v14 = vld [vmem:[#allocation6 + $0x10] sm:$0xff]  ;;  %v249_v15 = vld [vmem:[#allocation6 + $0x8] sm:$0xff]  ;;  %v248_v16 = vld [vmem:[#allocation6] sm:$0xff]  ;;  %p1455_p13 = por %p1454_p12, %p1453_p11 }
  0x23   :  { %1245 = vmatpush3.msra.mxu0 %v261_v2  ;;  %1272 = vmatprep.mubr.f32.mxu0 %v184_v4  ;;  %v185_v17 = vld [vmem:[#allocation3 + $0x8] sm:$0xff]  ;;  %v186_v18 = vld [vmem:[#allocation3 + $0x10] sm:$0xff]  ;;  %v216_v19 = vld [vmem:[#allocation3 + $0x100] sm:$0xff] }
  0x24   :  { %1246 = vmatprep.subr.mxu0 %v260_v3  ;;  %1386 = vmatpush3.msra.mxu1 %v261_v2  ;;  %v217_v20 = vld [vmem:[#allocation3 + $0x108] sm:$0xff]  ;;  %v218_v21 = vld [vmem:[#allocation3 + $0x110] sm:$0xff]  ;;  %v187_v22 = vld [vmem:[#allocation3 + $0x18] sm:$0xff]  ;;  %p1456_p0 = pnand %p1455_p13, %p1449_p10 }
  0x25   :  { %1247 = vmatpush3.msra.mxu0 %v260_v3  ;;  %1371 = vmatprep.subr.mxu1 %v260_v3  ;;  %v188_v23 = vld [vmem:[#allocation3 + $0x20] sm:$0xff]  ;;  %v219_v24 = vld [vmem:[#allocation3 + $0x118] sm:$0xff]  ;;  %v189_v26 = vld [vmem:[#allocation3 + $0x28] sm:$0xff] }
  0x26   :  { %1248 = vmatprep.subr.mxu0 %v259_v5  ;;  %1387 = vmatpush3.msra.mxu1 %v260_v3  ;;  %v220_v25 = vld [vmem:[#allocation3 + $0x120] sm:$0xff]  ;;  %v190_v27 = vld [vmem:[#allocation3 + $0x30] sm:$0xff]  ;;  %v221_v28 = vld [vmem:[#allocation3 + $0x128] sm:$0xff] }
  0x27   :  { %1249 = vmatpush3.msra.mxu0 %v259_v5  ;;  %1372 = vmatprep.subr.mxu1 %v259_v5  ;;  %v222_v29 = vld [vmem:[#allocation3 + $0x130] sm:$0xff]  ;;  %v191_v30 = vld [vmem:[#allocation3 + $0x38] sm:$0xff]  ;;  %v192_v31 = vld [vmem:[#allocation3 + $0x40] sm:$0xff] }
  0x28   :  { %1250 = vmatprep.subr.mxu0 %v258_v6  ;;  %1388 = vmatpush3.msra.mxu1 %v259_v5  ;;  %v223_v32 = vld [vmem:[#allocation3 + $0x138] sm:$0xff]  ;;  %v224_v33 = vld [vmem:[#allocation3 + $0x140] sm:$0xff]  ;;  %v193_v34 = vld [vmem:[#allocation3 + $0x48] sm:$0xff] }
  0x29   :  { %1251 = vmatpush3.msra.mxu0 %v258_v6  ;;  %1373 = vmatprep.subr.mxu1 %v258_v6  ;;  %v194_v35 = vld [vmem:[#allocation3 + $0x50] sm:$0xff]  ;;  %v225_v36 = vld [vmem:[#allocation3 + $0x148] sm:$0xff]  ;;  %v195_v38 = vld [vmem:[#allocation3 + $0x58] sm:$0xff] }
  0x2a   :  { %1252 = vmatprep.subr.mxu0 %v257_v7  ;;  %1389 = vmatpush3.msra.mxu1 %v258_v6  ;;  %v226_v37 = vld [vmem:[#allocation3 + $0x150] sm:$0xff]  ;;  %v196_v39 = vld [vmem:[#allocation3 + $0x60] sm:$0xff]  ;;  %v227_v40 = vld [vmem:[#allocation3 + $0x158] sm:$0xff] }
  0x2b   :  { %1253 = vmatpush3.msra.mxu0 %v257_v7  ;;  %1374 = vmatprep.subr.mxu1 %v257_v7  ;;  %v228_v41 = vld [vmem:[#allocation3 + $0x160] sm:$0xff]  ;;  %v197_v42 = vld [vmem:[#allocation3 + $0x68] sm:$0xff]  ;;  %v198_v43 = vld [vmem:[#allocation3 + $0x70] sm:$0xff] }
  0x2c   :  { %1254 = vmatprep.subr.mxu0 %v256_v8  ;;  %1390 = vmatpush3.msra.mxu1 %v257_v7  ;;  %v229_v44 = vld [vmem:[#allocation3 + $0x168] sm:$0xff]  ;;  %v230_v45 = vld [vmem:[#allocation3 + $0x170] sm:$0xff]  ;;  %v199_v46 = vld [vmem:[#allocation3 + $0x78] sm:$0xff] }
  0x2d   :  { %1255 = vmatpush3.msra.mxu0 %v256_v8  ;;  %1375 = vmatprep.subr.mxu1 %v256_v8  ;;  %v200_v47 = vld [vmem:[#allocation3 + $0x80] sm:$0xff]  ;;  %v231_v48 = vld [vmem:[#allocation3 + $0x178] sm:$0xff]  ;;  %v201_v50 = vld [vmem:[#allocation3 + $0x88] sm:$0xff] }
  0x2e   :  { %1256 = vmatprep.subr.mxu0 %v255_v9  ;;  %1391 = vmatpush3.msra.mxu1 %v256_v8  ;;  %v232_v49 = vld [vmem:[#allocation3 + $0x180] sm:$0xff]  ;;  %v202_v51 = vld [vmem:[#allocation3 + $0x90] sm:$0xff]  ;;  %v233_v52 = vld [vmem:[#allocation3 + $0x188] sm:$0xff] }
  0x2f   :  { %1257 = vmatpush3.msra.mxu0 %v255_v9  ;;  %1376 = vmatprep.subr.mxu1 %v255_v9  ;;  %v234_v53 = vld [vmem:[#allocation3 + $0x190] sm:$0xff]  ;;  %v203_v54 = vld [vmem:[#allocation3 + $0x98] sm:$0xff]  ;;  %v204_v55 = vld [vmem:[#allocation3 + $0xa0] sm:$0xff] }
  0x30   :  { %1258 = vmatprep.subr.mxu0 %v254_v10  ;;  %1392 = vmatpush3.msra.mxu1 %v255_v9  ;;  %v235_v56 = vld [vmem:[#allocation3 + $0x198] sm:$0xff]  ;;  %v236_v57 = vld [vmem:[#allocation3 + $0x1a0] sm:$0xff]  ;;  %v205_v58 = vld [vmem:[#allocation3 + $0xa8] sm:$0xff] }
  0x31   :  { %1259 = vmatpush3.msra.mxu0 %v254_v10  ;;  %1377 = vmatprep.subr.mxu1 %v254_v10  ;;  %v206_v59 = vld [vmem:[#allocation3 + $0xb0] sm:$0xff]  ;;  %v237_v60 = vld [vmem:[#allocation3 + $0x1a8] sm:$0xff]  ;;  %v207_v62 = vld [vmem:[#allocation3 + $0xb8] sm:$0xff] }
  0x32   :  { %1260 = vmatprep.subr.mxu0 %v253_v11  ;;  %1393 = vmatpush3.msra.mxu1 %v254_v10  ;;  %v238_v61 = vld [vmem:[#allocation3 + $0x1b0] sm:$0xff]  ;;  %v208_v63 = vld [vmem:[#allocation3 + $0xc0] sm:$0xff]  ;;  %v239_v0 = vld [vmem:[#allocation3 + $0x1b8] sm:$0xff] }
  0x33   :  { %1261 = vmatpush3.msra.mxu0 %v253_v11  ;;  %1378 = vmatprep.subr.mxu1 %v253_v11  ;;  %v240_v1 = vld [vmem:[#allocation3 + $0x1c0] sm:$0xff]  ;;  %v209_v2 = vld [vmem:[#allocation3 + $0xc8] sm:$0xff]  ;;  %v210_v3 = vld [vmem:[#allocation3 + $0xd0] sm:$0xff] }
  0x34   :  { %1262 = vmatprep.subr.mxu0 %v252_v12  ;;  %1394 = vmatpush3.msra.mxu1 %v253_v11  ;;  %v241_v4 = vld [vmem:[#allocation3 + $0x1c8] sm:$0xff]  ;;  %v242_v5 = vld [vmem:[#allocation3 + $0x1d0] sm:$0xff]  ;;  %v211_v6 = vld [vmem:[#allocation3 + $0xd8] sm:$0xff] }
  0x35   :  { %1263 = vmatpush3.msra.mxu0 %v252_v12  ;;  %1379 = vmatprep.subr.mxu1 %v252_v12  ;;  %v212_v7 = vld [vmem:[#allocation3 + $0xe0] sm:$0xff]  ;;  %v243_v8 = vld [vmem:[#allocation3 + $0x1d8] sm:$0xff]  ;;  %v213_v10 = vld [vmem:[#allocation3 + $0xe8] sm:$0xff] }
  0x36   :  { %1264 = vmatprep.subr.mxu0 %v251_v13  ;;  %1395 = vmatpush3.msra.mxu1 %v252_v12  ;;  %v244_v9 = vld [vmem:[#allocation3 + $0x1e0] sm:$0xff]  ;;  %v214_v11 = vld [vmem:[#allocation3 + $0xf0] sm:$0xff]  ;;  %v245_v12 = vld [vmem:[#allocation3 + $0x1e8] sm:$0xff] }
  0x37   :  { %1265 = vmatpush3.msra.mxu0 %v251_v13  ;;  %1380 = vmatprep.subr.mxu1 %v251_v13 }
  0x38   :  { %1266 = vmatprep.subr.mxu0 %v250_v14  ;;  %1396 = vmatpush3.msra.mxu1 %v251_v13  ;;  %v246_v13 = vld [vmem:[#allocation3 + $0x1f0] sm:$0xff] }
  0x39   :  { %1267 = vmatpush3.msra.mxu0 %v250_v14  ;;  %1381 = vmatprep.subr.mxu1 %v250_v14 }
  0x3a   :  { %1268 = vmatprep.subr.mxu0 %v249_v15  ;;  %1397 = vmatpush3.msra.mxu1 %v250_v14  ;;  %v215_v14 = vld [vmem:[#allocation3 + $0xf8] sm:$0xff] }
  0x3b   :  { %1269 = vmatpush3.msra.mxu0 %v249_v15  ;;  %1382 = vmatprep.subr.mxu1 %v249_v15 }
  0x3c   :  { %1270 = vmatprep.subr.mxu0 %v248_v16  ;;  %1398 = vmatpush3.msra.mxu1 %v249_v15  ;;  %v247_v15 = vld [vmem:[#allocation3 + $0x1f8] sm:$0xff] }
  0x3d   :  { %1271 = vmatpush3.msra.mxu0 %v248_v16  ;;  %1383 = vmatprep.subr.mxu1 %v248_v16 }
  0x3e   :  { %1273 = vmatmul.mubr.f32.vlgmr.msra.gmra.mxu0 %v185_v17  ;;  %1399 = vmatpush3.msra.mxu1 %v248_v16 }
  0x3f   :  { %1275 = vmatprep.mubr.f32.mxu0 %v186_v18  ;;  %1320 = vmatprep.mubr.f32.mxu1 %v216_v19 }
  0x40   :  { %1321 = vmatmul.mubr.f32.vlgmr.msra.gmra.mxu1 %v217_v20 }
  0x41   :  { %1323 = vmatprep.mubr.f32.mxu1 %v218_v21 }
  0x42   :  { %1276 = vmatmul.mubr.f32.gmra.mxu0 %v187_v22 }
  0x43   :  { %1278 = vmatprep.mubr.f32.mxu0 %v188_v23 }
  0x44   :  { %1324 = vmatmul.mubr.f32.gmra.mxu1 %v219_v24 }
  0x45   :  { %1326 = vmatprep.mubr.f32.mxu1 %v220_v25 }
  0x46   :  { %1279 = vmatmul.mubr.f32.gmra.mxu0 %v189_v26 }
  0x47   :  { %1281 = vmatprep.mubr.f32.mxu0 %v190_v27 }
  0x48   :  { %1327 = vmatmul.mubr.f32.gmra.mxu1 %v221_v28 }
  0x49   :  { %1329 = vmatprep.mubr.f32.mxu1 %v222_v29 }
  0x4a   :  { %1282 = vmatmul.mubr.f32.gmra.mxu0 %v191_v30 }
  0x4b   :  { %1284 = vmatprep.mubr.f32.mxu0 %v192_v31 }
  0x4c   :  { %1330 = vmatmul.mubr.f32.gmra.mxu1 %v223_v32 }
  0x4d   :  { %1332 = vmatprep.mubr.f32.mxu1 %v224_v33 }
  0x4e   :  { %1285 = vmatmul.mubr.f32.gmra.mxu0 %v193_v34 }
  0x4f   :  { %1287 = vmatprep.mubr.f32.mxu0 %v194_v35 }
  0x50   :  { %1333 = vmatmul.mubr.f32.gmra.mxu1 %v225_v36 }
  0x51   :  { %1335 = vmatprep.mubr.f32.mxu1 %v226_v37 }
  0x52   :  { %1288 = vmatmul.mubr.f32.gmra.mxu0 %v195_v38 }
  0x53   :  { %1290 = vmatprep.mubr.f32.mxu0 %v196_v39 }
  0x54   :  { %1336 = vmatmul.mubr.f32.gmra.mxu1 %v227_v40 }
  0x55   :  { %1338 = vmatprep.mubr.f32.mxu1 %v228_v41 }
  0x56   :  { %1291 = vmatmul.mubr.f32.gmra.mxu0 %v197_v42 }
  0x57   :  { %1293 = vmatprep.mubr.f32.mxu0 %v198_v43 }
  0x58   :  { %1339 = vmatmul.mubr.f32.gmra.mxu1 %v229_v44 }
  0x59   :  { %1341 = vmatprep.mubr.f32.mxu1 %v230_v45 }
  0x5a   :  { %1294 = vmatmul.mubr.f32.gmra.mxu0 %v199_v46 }
  0x5b   :  { %1296 = vmatprep.mubr.f32.mxu0 %v200_v47 }
  0x5c   :  { %1342 = vmatmul.mubr.f32.gmra.mxu1 %v231_v48 }
  0x5d   :  { %1344 = vmatprep.mubr.f32.mxu1 %v232_v49 }
  0x5e   :  { %1297 = vmatmul.mubr.f32.gmra.mxu0 %v201_v50 }
  0x5f   :  { %1299 = vmatprep.mubr.f32.mxu0 %v202_v51 }
  0x60   :  { %1345 = vmatmul.mubr.f32.gmra.mxu1 %v233_v52 }
  0x61   :  { %1347 = vmatprep.mubr.f32.mxu1 %v234_v53 }
  0x62   :  { %1300 = vmatmul.mubr.f32.gmra.mxu0 %v203_v54 }
  0x63   :  { %1302 = vmatprep.mubr.f32.mxu0 %v204_v55 }
  0x64   :  { %1348 = vmatmul.mubr.f32.gmra.mxu1 %v235_v56 }
  0x65   :  { %1350 = vmatprep.mubr.f32.mxu1 %v236_v57 }
  0x66   :  { %1303 = vmatmul.mubr.f32.gmra.mxu0 %v205_v58 }
  0x67   :  { %1305 = vmatprep.mubr.f32.mxu0 %v206_v59 }
  0x68   :  { %1351 = vmatmul.mubr.f32.gmra.mxu1 %v237_v60 }
  0x69   :  { %1353 = vmatprep.mubr.f32.mxu1 %v238_v61 }
  0x6a   :  { %1306 = vmatmul.mubr.f32.gmra.mxu0 %v207_v62 }
  0x6b   :  { %1308 = vmatprep.mubr.f32.mxu0 %v208_v63 }
  0x6c   :  { %1354 = vmatmul.mubr.f32.gmra.mxu1 %v239_v0 }
  0x6d   :  { %1356 = vmatprep.mubr.f32.mxu1 %v240_v1 }
  0x6e   :  { %1309 = vmatmul.mubr.f32.gmra.mxu0 %v209_v2 }
  0x6f   :  { %1311 = vmatprep.mubr.f32.mxu0 %v210_v3 }
  0x70   :  { %1357 = vmatmul.mubr.f32.gmra.mxu1 %v241_v4 }
  0x71   :  { %1359 = vmatprep.mubr.f32.mxu1 %v242_v5 }
  0x72   :  { %1312 = vmatmul.mubr.f32.gmra.mxu0 %v211_v6 }
  0x73   :  { %1314 = vmatprep.mubr.f32.mxu0 %v212_v7 }
  0x74   :  { %1360 = vmatmul.mubr.f32.gmra.mxu1 %v243_v8 }
  0x75   :  { %1362 = vmatprep.mubr.f32.mxu1 %v244_v9 }
  0x76   :  { %1315 = vmatmul.mubr.f32.gmra.mxu0 %v213_v10 }
  0x77   :  { %1317 = vmatprep.mubr.f32.mxu0 %v214_v11 }
  0x78   :  { %1363 = vmatmul.mubr.f32.gmra.mxu1 %v245_v12 }
  0x79   :  { %1365 = vmatprep.mubr.f32.mxu1 %v246_v13 }
  0x7a   :  { %1318 = vmatmul.mubr.f32.gmra.mxu0 %v215_v14 }
  0x7c   :  { %1366 = vmatmul.mubr.f32.gmra.mxu1 %v247_v15 }
  0xfe   :  { %v1274_v16 = vpop.f32.mrf.mxu0 }
  0xff   :  { %852 = vst [vmem:[#allocation8 + $0x8] sm:$0xff] %v1274_v16  ;;  %v983_v22 = vmul.f32 %v1274_v16, %v1274_v16 }
 0x100   :  { %v330_v17 = vpop.f32.mrf.mxu0  ;;  %v1560_v18 = vpop.f32.mrf.mxu1 }
 0x101   :  { %851 = vst [vmem:[#allocation8] sm:$0xff] %v330_v17  ;;  %v982_v19 = vmul.f32 %v330_v17, %v330_v17  ;;  %884 = vst [vmem:[#allocation8 + $0x108] sm:$0xff] %v1560_v18  ;;  %v916_v23 = vadd.f32 %v1274_v16, %v330_v17 }
 0x102   :  { %v1277_v20 = vpop.f32.mrf.mxu0  ;;  %v1563_v21 = vpop.f32.mrf.mxu1 }
 0x103   :  { %854 = vst [vmem:[#allocation8 + $0x18] sm:$0xff] %v1277_v20  ;;  %883 = vst [vmem:[#allocation8 + $0x100] sm:$0xff] %v1563_v21  ;;  %v1046_v26 = vadd.f32 %v983_v22, %v982_v19  ;;  %v985_v31 = vmul.f32 %v1277_v20, %v1277_v20 }
 0x104   :  { %v340_v24 = vpop.f32.mrf.mxu0  ;;  %v1566_v25 = vpop.f32.mrf.mxu1 }
 0x105   :  { %853 = vst [vmem:[#allocation8 + $0x10] sm:$0xff] %v340_v24  ;;  %v917_v27 = vadd.f32 %v916_v23, %v340_v24  ;;  %v984_v28 = vmul.f32 %v340_v24, %v340_v24  ;;  %886 = vst [vmem:[#allocation8 + $0x118] sm:$0xff] %v1566_v25 }
 0x106   :  { %v1280_v29 = vpop.f32.mrf.mxu0  ;;  %v1569_v30 = vpop.f32.mrf.mxu1 }
 0x107   :  { %v1047_v32 = vadd.f32 %v1046_v26, %v984_v28  ;;  %856 = vst [vmem:[#allocation8 + $0x28] sm:$0xff] %v1280_v29  ;;  %v918_v33 = vadd.f32 %v1277_v20, %v917_v27  ;;  %885 = vst [vmem:[#allocation8 + $0x110] sm:$0xff] %v1569_v30  ;;  %v987_v41 = vmul.f32 %v1280_v29, %v1280_v29 }
 0x108   :  { %v350_v34 = vpop.f32.mrf.mxu0  ;;  %v1572_v35 = vpop.f32.mrf.mxu1 }
 0x109   :  { %855 = vst [vmem:[#allocation8 + $0x20] sm:$0xff] %v350_v34  ;;  %v919_v36 = vadd.f32 %v918_v33, %v350_v34  ;;  %v986_v37 = vmul.f32 %v350_v34, %v350_v34  ;;  %v1048_v38 = vadd.f32 %v1047_v32, %v985_v31  ;;  %888 = vst [vmem:[#allocation8 + $0x128] sm:$0xff] %v1572_v35 }
 0x10a   :  { %v1283_v39 = vpop.f32.mrf.mxu0  ;;  %v1575_v40 = vpop.f32.mrf.mxu1 }
 0x10b   :  { %v1049_v42 = vadd.f32 %v1048_v38, %v986_v37  ;;  %858 = vst [vmem:[#allocation8 + $0x38] sm:$0xff] %v1283_v39  ;;  %v920_v43 = vadd.f32 %v1280_v29, %v919_v36  ;;  %887 = vst [vmem:[#allocation8 + $0x120] sm:$0xff] %v1575_v40  ;;  %v989_v51 = vmul.f32 %v1283_v39, %v1283_v39 }
 0x10c   :  { %v360_v44 = vpop.f32.mrf.mxu0  ;;  %v1578_v45 = vpop.f32.mrf.mxu1 }
 0x10d   :  { %857 = vst [vmem:[#allocation8 + $0x30] sm:$0xff] %v360_v44  ;;  %v921_v46 = vadd.f32 %v920_v43, %v360_v44  ;;  %v988_v47 = vmul.f32 %v360_v44, %v360_v44  ;;  %v1050_v48 = vadd.f32 %v1049_v42, %v987_v41  ;;  %890 = vst [vmem:[#allocation8 + $0x138] sm:$0xff] %v1578_v45 }
 0x10e   :  { %v1286_v49 = vpop.f32.mrf.mxu0  ;;  %v1581_v50 = vpop.f32.mrf.mxu1 }
 0x10f   :  { %v1051_v52 = vadd.f32 %v1050_v48, %v988_v47  ;;  %860 = vst [vmem:[#allocation8 + $0x48] sm:$0xff] %v1286_v49  ;;  %v922_v53 = vadd.f32 %v1283_v39, %v921_v46  ;;  %889 = vst [vmem:[#allocation8 + $0x130] sm:$0xff] %v1581_v50  ;;  %v991_v61 = vmul.f32 %v1286_v49, %v1286_v49 }
 0x110   :  { %v370_v54 = vpop.f32.mrf.mxu0  ;;  %v1584_v55 = vpop.f32.mrf.mxu1 }
 0x111   :  { %859 = vst [vmem:[#allocation8 + $0x40] sm:$0xff] %v370_v54  ;;  %v923_v56 = vadd.f32 %v922_v53, %v370_v54  ;;  %v990_v57 = vmul.f32 %v370_v54, %v370_v54  ;;  %v1052_v58 = vadd.f32 %v1051_v52, %v989_v51  ;;  %892 = vst [vmem:[#allocation8 + $0x148] sm:$0xff] %v1584_v55 }
 0x112   :  { %v1289_v59 = vpop.f32.mrf.mxu0  ;;  %v1587_v60 = vpop.f32.mrf.mxu1 }
 0x113   :  { %v1053_v62 = vadd.f32 %v1052_v58, %v990_v57  ;;  %862 = vst [vmem:[#allocation8 + $0x58] sm:$0xff] %v1289_v59  ;;  %v924_v63 = vadd.f32 %v1286_v49, %v923_v56  ;;  %891 = vst [vmem:[#allocation8 + $0x140] sm:$0xff] %v1587_v60  ;;  %v993_v7 = vmul.f32 %v1289_v59, %v1289_v59 }
 0x114   :  { %v380_v0 = vpop.f32.mrf.mxu0  ;;  %v1590_v1 = vpop.f32.mrf.mxu1 }
 0x115   :  { %861 = vst [vmem:[#allocation8 + $0x50] sm:$0xff] %v380_v0  ;;  %v925_v2 = vadd.f32 %v924_v63, %v380_v0  ;;  %v992_v3 = vmul.f32 %v380_v0, %v380_v0  ;;  %v1054_v4 = vadd.f32 %v1053_v62, %v991_v61  ;;  %894 = vst [vmem:[#allocation8 + $0x158] sm:$0xff] %v1590_v1 }
 0x116   :  { %v1292_v5 = vpop.f32.mrf.mxu0  ;;  %v1593_v6 = vpop.f32.mrf.mxu1 }
 0x117   :  { %v1055_v8 = vadd.f32 %v1054_v4, %v992_v3  ;;  %864 = vst [vmem:[#allocation8 + $0x68] sm:$0xff] %v1292_v5  ;;  %v926_v9 = vadd.f32 %v1289_v59, %v925_v2  ;;  %893 = vst [vmem:[#allocation8 + $0x150] sm:$0xff] %v1593_v6  ;;  %v995_v17 = vmul.f32 %v1292_v5, %v1292_v5 }
 0x118   :  { %v390_v10 = vpop.f32.mrf.mxu0  ;;  %v1596_v11 = vpop.f32.mrf.mxu1 }
 0x119   :  { %863 = vst [vmem:[#allocation8 + $0x60] sm:$0xff] %v390_v10  ;;  %v927_v12 = vadd.f32 %v926_v9, %v390_v10  ;;  %v994_v13 = vmul.f32 %v390_v10, %v390_v10  ;;  %v1056_v14 = vadd.f32 %v1055_v8, %v993_v7  ;;  %896 = vst [vmem:[#allocation8 + $0x168] sm:$0xff] %v1596_v11 }
 0x11a   :  { %v1295_v15 = vpop.f32.mrf.mxu0  ;;  %v1599_v16 = vpop.f32.mrf.mxu1 }
 0x11b   :  { %v1057_v19 = vadd.f32 %v1056_v14, %v994_v13  ;;  %866 = vst [vmem:[#allocation8 + $0x78] sm:$0xff] %v1295_v15  ;;  %v928_v20 = vadd.f32 %v1292_v5, %v927_v12  ;;  %895 = vst [vmem:[#allocation8 + $0x160] sm:$0xff] %v1599_v16  ;;  %v997_v31 = vmul.f32 %v1295_v15, %v1295_v15 }
 0x11c   :  { %v400_v22 = vpop.f32.mrf.mxu0  ;;  %v1602_v23 = vpop.f32.mrf.mxu1 }
 0x11d   :  { %865 = vst [vmem:[#allocation8 + $0x70] sm:$0xff] %v400_v22  ;;  %v929_v24 = vadd.f32 %v928_v20, %v400_v22  ;;  %v996_v26 = vmul.f32 %v400_v22, %v400_v22  ;;  %v1058_v27 = vadd.f32 %v1057_v19, %v995_v17  ;;  %898 = vst [vmem:[#allocation8 + $0x178] sm:$0xff] %v1602_v23 }
 0x11e   :  { %v1298_v28 = vpop.f32.mrf.mxu0  ;;  %v1605_v29 = vpop.f32.mrf.mxu1 }
 0x11f   :  { %v1059_v32 = vadd.f32 %v1058_v27, %v996_v26  ;;  %868 = vst [vmem:[#allocation8 + $0x88] sm:$0xff] %v1298_v28  ;;  %v930_v33 = vadd.f32 %v1295_v15, %v929_v24  ;;  %897 = vst [vmem:[#allocation8 + $0x170] sm:$0xff] %v1605_v29  ;;  %v999_v43 = vmul.f32 %v1298_v28, %v1298_v28 }
 0x120   :  { %v410_v34 = vpop.f32.mrf.mxu0  ;;  %v1608_v36 = vpop.f32.mrf.mxu1 }
 0x121   :  { %867 = vst [vmem:[#allocation8 + $0x80] sm:$0xff] %v410_v34  ;;  %v931_v37 = vadd.f32 %v930_v33, %v410_v34  ;;  %v998_v38 = vmul.f32 %v410_v34, %v410_v34  ;;  %v1060_v39 = vadd.f32 %v1059_v32, %v997_v31  ;;  %900 = vst [vmem:[#allocation8 + $0x188] sm:$0xff] %v1608_v36 }
 0x122   :  { %v1301_v41 = vpop.f32.mrf.mxu0  ;;  %v1611_v42 = vpop.f32.mrf.mxu1 }
 0x123   :  { %v1061_v44 = vadd.f32 %v1060_v39, %v998_v38  ;;  %870 = vst [vmem:[#allocation8 + $0x98] sm:$0xff] %v1301_v41  ;;  %v932_v46 = vadd.f32 %v1298_v28, %v931_v37  ;;  %899 = vst [vmem:[#allocation8 + $0x180] sm:$0xff] %v1611_v42  ;;  %v1001_v56 = vmul.f32 %v1301_v41, %v1301_v41 }
 0x124   :  { %v420_v47 = vpop.f32.mrf.mxu0  ;;  %v1614_v48 = vpop.f32.mrf.mxu1 }
 0x125   :  { %869 = vst [vmem:[#allocation8 + $0x90] sm:$0xff] %v420_v47  ;;  %v933_v49 = vadd.f32 %v932_v46, %v420_v47  ;;  %v1000_v51 = vmul.f32 %v420_v47, %v420_v47  ;;  %v1062_v52 = vadd.f32 %v1061_v44, %v999_v43  ;;  %902 = vst [vmem:[#allocation8 + $0x198] sm:$0xff] %v1614_v48 }
 0x126   :  { %v1304_v53 = vpop.f32.mrf.mxu0  ;;  %v1617_v54 = vpop.f32.mrf.mxu1 }
 0x127   :  { %v1063_v57 = vadd.f32 %v1062_v52, %v1000_v51  ;;  %872 = vst [vmem:[#allocation8 + $0xa8] sm:$0xff] %v1304_v53  ;;  %v934_v58 = vadd.f32 %v1301_v41, %v933_v49  ;;  %901 = vst [vmem:[#allocation8 + $0x190] sm:$0xff] %v1617_v54  ;;  %v1003_v4 = vmul.f32 %v1304_v53, %v1304_v53 }
 0x128   :  { %v430_v59 = vpop.f32.mrf.mxu0  ;;  %v1620_v61 = vpop.f32.mrf.mxu1 }
 0x129   :  { %871 = vst [vmem:[#allocation8 + $0xa0] sm:$0xff] %v430_v59  ;;  %v935_v62 = vadd.f32 %v934_v58, %v430_v59  ;;  %v1002_v63 = vmul.f32 %v430_v59, %v430_v59  ;;  %v1064_v0 = vadd.f32 %v1063_v57, %v1001_v56  ;;  %904 = vst [vmem:[#allocation8 + $0x1a8] sm:$0xff] %v1620_v61 }
 0x12a   :  { %v1307_v2 = vpop.f32.mrf.mxu0  ;;  %v1623_v3 = vpop.f32.mrf.mxu1 }
 0x12b   :  { %v1065_v5 = vadd.f32 %v1064_v0, %v1002_v63  ;;  %874 = vst [vmem:[#allocation8 + $0xb8] sm:$0xff] %v1307_v2  ;;  %v936_v7 = vadd.f32 %v1304_v53, %v935_v62  ;;  %903 = vst [vmem:[#allocation8 + $0x1a0] sm:$0xff] %v1623_v3  ;;  %v1005_v17 = vmul.f32 %v1307_v2, %v1307_v2 }
 0x12c   :  { %v440_v8 = vpop.f32.mrf.mxu0  ;;  %v1626_v9 = vpop.f32.mrf.mxu1 }
 0x12d   :  { %873 = vst [vmem:[#allocation8 + $0xb0] sm:$0xff] %v440_v8  ;;  %v937_v10 = vadd.f32 %v936_v7, %v440_v8  ;;  %v1004_v12 = vmul.f32 %v440_v8, %v440_v8  ;;  %v1066_v13 = vadd.f32 %v1065_v5, %v1003_v4  ;;  %906 = vst [vmem:[#allocation8 + $0x1b8] sm:$0xff] %v1626_v9 }
 0x12e   :  { %v1310_v14 = vpop.f32.mrf.mxu0  ;;  %v1629_v15 = vpop.f32.mrf.mxu1 }
 0x12f   :  { %v1067_v19 = vadd.f32 %v1066_v13, %v1004_v12  ;;  %876 = vst [vmem:[#allocation8 + $0xc8] sm:$0xff] %v1310_v14  ;;  %v938_v20 = vadd.f32 %v1307_v2, %v937_v10  ;;  %905 = vst [vmem:[#allocation8 + $0x1b0] sm:$0xff] %v1629_v15  ;;  %v1007_v33 = vmul.f32 %v1310_v14, %v1310_v14 }
 0x130   :  { %v450_v22 = vpop.f32.mrf.mxu0  ;;  %v1632_v24 = vpop.f32.mrf.mxu1 }
 0x131   :  { %875 = vst [vmem:[#allocation8 + $0xc0] sm:$0xff] %v450_v22  ;;  %v939_v26 = vadd.f32 %v938_v20, %v450_v22  ;;  %v1006_v27 = vmul.f32 %v450_v22, %v450_v22  ;;  %v1068_v28 = vadd.f32 %v1067_v19, %v1005_v17  ;;  %908 = vst [vmem:[#allocation8 + $0x1c8] sm:$0xff] %v1632_v24 }
 0x132   :  { %v1313_v31 = vpop.f32.mrf.mxu0  ;;  %v1635_v32 = vpop.f32.mrf.mxu1 }
 0x133   :  { %v1069_v34 = vadd.f32 %v1068_v28, %v1006_v27  ;;  %878 = vst [vmem:[#allocation8 + $0xd8] sm:$0xff] %v1313_v31  ;;  %v940_v37 = vadd.f32 %v1310_v14, %v939_v26  ;;  %907 = vst [vmem:[#allocation8 + $0x1c0] sm:$0xff] %v1635_v32  ;;  %v1009_v49 = vmul.f32 %v1313_v31, %v1313_v31 }
 0x134   :  { %v460_v38 = vpop.f32.mrf.mxu0  ;;  %v1638_v39 = vpop.f32.mrf.mxu1 }
 0x135   :  { %877 = vst [vmem:[#allocation8 + $0xd0] sm:$0xff] %v460_v38  ;;  %v941_v41 = vadd.f32 %v940_v37, %v460_v38  ;;  %v1008_v43 = vmul.f32 %v460_v38, %v460_v38  ;;  %v1070_v44 = vadd.f32 %v1069_v34, %v1007_v33  ;;  %910 = vst [vmem:[#allocation8 + $0x1d8] sm:$0xff] %v1638_v39 }
 0x136   :  { %v1316_v46 = vpop.f32.mrf.mxu0  ;;  %v1641_v47 = vpop.f32.mrf.mxu1 }
 0x137   :  { %v1071_v51 = vadd.f32 %v1070_v44, %v1008_v43  ;;  %880 = vst [vmem:[#allocation8 + $0xe8] sm:$0xff] %v1316_v46  ;;  %v942_v52 = vadd.f32 %v1313_v31, %v941_v41  ;;  %909 = vst [vmem:[#allocation8 + $0x1d0] sm:$0xff] %v1641_v47  ;;  %v1011_v0 = vmul.f32 %v1316_v46, %v1316_v46 }
 0x138   :  { %v470_v53 = vpop.f32.mrf.mxu0  ;;  %v1644_v56 = vpop.f32.mrf.mxu1 }
 0x139   :  { %879 = vst [vmem:[#allocation8 + $0xe0] sm:$0xff] %v470_v53  ;;  %v943_v57 = vadd.f32 %v942_v52, %v470_v53  ;;  %v1010_v58 = vmul.f32 %v470_v53, %v470_v53  ;;  %v1072_v59 = vadd.f32 %v1071_v51, %v1009_v49  ;;  %912 = vst [vmem:[#allocation8 + $0x1e8] sm:$0xff] %v1644_v56 }
 0x13a   :  { %v1319_v62 = vpop.f32.mrf.mxu0  ;;  %v1647_v63 = vpop.f32.mrf.mxu1 }
 0x13b   :  { %v1073_v2 = vadd.f32 %v1072_v59, %v1010_v58  ;;  %882 = vst [vmem:[#allocation8 + $0xf8] sm:$0xff] %v1319_v62  ;;  %v944_v4 = vadd.f32 %v1316_v46, %v943_v57  ;;  %911 = vst [vmem:[#allocation8 + $0x1e0] sm:$0xff] %v1647_v63  ;;  %v1013_v14 = vmul.f32 %v1319_v62, %v1319_v62 }
 0x13c   :  { %v480_v5 = vpop.f32.mrf.mxu0  ;;  %v1650_v7 = vpop.f32.mrf.mxu1 }
 0x13d   :  { %881 = vst [vmem:[#allocation8 + $0xf0] sm:$0xff] %v480_v5  ;;  %v945_v8 = vadd.f32 %v944_v4, %v480_v5  ;;  %v1012_v10 = vmul.f32 %v480_v5, %v480_v5  ;;  %v1074_v12 = vadd.f32 %v1073_v2, %v1011_v0  ;;  %914 = vst [vmem:[#allocation8 + $0x1f8] sm:$0xff] %v1650_v7 }
 0x13e   :  { %v1653_v13 = vpop.f32.mrf.mxu1 }
 0x13f   :  { %v946_v17 = vadd.f32 %v1319_v62, %v945_v8  ;;  %v1075_v19 = vadd.f32 %v1074_v12, %v1012_v10  ;;  %913 = vst [vmem:[#allocation8 + $0x1f0] sm:$0xff] %v1653_v13 }
 0x140   :  { %1459 = shalt.err (!%p1456_p0)
}
 0x141   :  { %1126 = dma.vmem_to_hbm [thread:$0]  %s1121_s1, 8192, %s1766_s2, [#allocation5], %s1517_s18, %s1517_s18, %s1518_s19   ;;  %v1076_v20 = vadd.f32 %v1075_v19, %v1013_v14  ;;  %v947_v22 = vadd.f32 %v946_v17, %v1563_v21  ;;  %v1014_v26 = vmul.f32 %v1563_v21, %v1563_v21  ;;  %v1015_v27 = vmul.f32 %v1560_v18, %v1560_v18 }
 0x142   :  { %v1016_v34 = vmul.f32 %v1569_v30, %v1569_v30  ;;  %v1017_v38 = vmul.f32 %v1566_v25, %v1566_v25  ;;  %v1018_v44 = vmul.f32 %v1575_v40, %v1575_v40  ;;  %v1020_v52 = vmul.f32 %v1581_v50, %v1581_v50  ;;  %s1521_s2 = smov [#allocation9]   ;;  %s1522_s5 = smov [#allocation11]  }
 0x143   :  { %v1077_v28 = vadd.f32 %v1076_v20, %v1014_v26  ;;  %v948_v31 = vadd.f32 %v1560_v18, %v947_v22  ;;  %v1019_v18 = vmul.f32 %v1572_v35, %v1572_v35  ;;  %v1022_v59 = vmul.f32 %v1587_v60, %v1587_v60  ;;  %s1133_s30 = sshll.u32 %s1521_s2, 4  ;;  %s1143_s6 = sshll.u32 %s1522_s5, 4  ;;  %s1134_s30 = int_to_ptr.vmem [resolvable:$true] %s1133_s30  ;;  %s1144_s6 = int_to_ptr.vmem [resolvable:$true] %s1143_s6 }
 0x144   :  { %v1024_v4 = vmul.f32 %v1593_v6, %v1593_v6  ;;  %v1026_v12 = vmul.f32 %v1599_v16, %v1599_v16  ;;  %v1028_v20 = vmul.f32 %v1605_v29, %v1605_v29  ;;  %s1468_s7 = scalar_lea.vmem %s1134_s30, 128  ;;  %p1473_p2 = scmp.lt.s32.totalorder %s1134_s30, %s1134_s30 }
 0x145   :  { %v949_v33 = vadd.f32 %v948_v31, %v1569_v30  ;;  %v1078_v37 = vadd.f32 %v1077_v28, %v1015_v27  ;;  %v1030_v28 = vmul.f32 %v1611_v42, %v1611_v42  ;;  %p1469_p1 = scmp.ne.s32.totalorder %s1134_s30, %s1468_s7  ;;  %p1474_p3 = scmp.lt.s32.totalorder %s1468_s7, %s1468_s7 }
 0x147   :  { %v1079_v41 = vadd.f32 %v1078_v37, %v1016_v34  ;;  %v950_v43 = vadd.f32 %v1566_v25, %v949_v33  ;;  %v1021_v25 = vmul.f32 %v1578_v45, %v1578_v45  ;;  %v1032_v37 = vmul.f32 %v1617_v54, %v1617_v54  ;;  %p1475_p4 = por %p1474_p3, %p1473_p2 }
 0x149   :  { %v951_v21 = vadd.f32 %v950_v43, %v1575_v40  ;;  %v1080_v46 = vadd.f32 %v1079_v41, %v1017_v38  ;;  %p1476_p5 = pnand %p1475_p4, %p1469_p1 }
 0x14b   :  { %v1081_v49 = vadd.f32 %v1080_v46, %v1018_v44  ;;  %v952_v51 = vadd.f32 %v1572_v35, %v951_v21  ;;  %v1023_v35 = vmul.f32 %v1584_v55, %v1584_v55  ;;  %v1034_v21 = vmul.f32 %v1623_v3, %v1623_v3 }
 0x14d   :  { %v953_v30 = vadd.f32 %v952_v51, %v1581_v50  ;;  %v1082_v53 = vadd.f32 %v1081_v49, %v1019_v18  ;;  %v1036_v49 = vmul.f32 %v1629_v15, %v1629_v15 }
 0x14f   :  { %v1083_v57 = vadd.f32 %v1082_v53, %v1020_v52  ;;  %v954_v58 = vadd.f32 %v1578_v45, %v953_v30  ;;  %v1025_v45 = vmul.f32 %v1590_v1, %v1590_v1  ;;  %v1038_v53 = vmul.f32 %v1635_v32, %v1635_v32 }
 0x151   :  { %v955_v40 = vadd.f32 %v954_v58, %v1587_v60  ;;  %v1084_v62 = vadd.f32 %v1083_v57, %v1021_v25 }
 0x153   :  { %v1085_v0 = vadd.f32 %v1084_v62, %v1022_v59  ;;  %v956_v2 = vadd.f32 %v1584_v55, %v955_v40  ;;  %v1027_v55 = vmul.f32 %v1596_v11, %v1596_v11  ;;  %v1040_v40 = vmul.f32 %v1641_v47, %v1641_v47 }
 0x155   :  { %v957_v50 = vadd.f32 %v956_v2, %v1593_v6  ;;  %v1086_v5 = vadd.f32 %v1085_v0, %v1023_v35  ;;  %v1042_v0 = vmul.f32 %v1647_v63, %v1647_v63 }
 0x157   :  { %v1087_v8 = vadd.f32 %v1086_v5, %v1024_v4  ;;  %v958_v10 = vadd.f32 %v1590_v1, %v957_v50  ;;  %v1029_v1 = vmul.f32 %v1602_v23, %v1602_v23  ;;  %v1044_v5 = vmul.f32 %v1653_v13, %v1653_v13 }
 0x159   :  { %v959_v60 = vadd.f32 %v958_v10, %v1599_v16  ;;  %v1088_v14 = vadd.f32 %v1087_v8, %v1025_v45 }
 0x15b   :  { %v1089_v17 = vadd.f32 %v1088_v14, %v1026_v12  ;;  %v960_v19 = vadd.f32 %v1596_v11, %v959_v60  ;;  %v1031_v11 = vmul.f32 %v1608_v36, %v1608_v36 }
 0x15d   :  { %v961_v6 = vadd.f32 %v960_v19, %v1605_v29  ;;  %v1090_v22 = vadd.f32 %v1089_v17, %v1027_v55 }
 0x15f   :  { %v1091_v26 = vadd.f32 %v1090_v22, %v1028_v20  ;;  %v962_v27 = vadd.f32 %v1602_v23, %v961_v6  ;;  %v1033_v23 = vmul.f32 %v1614_v48, %v1614_v48 }
 0x161   :  { %v963_v16 = vadd.f32 %v962_v27, %v1611_v42  ;;  %v1092_v31 = vadd.f32 %v1091_v26, %v1029_v1 }
 0x163   :  { %v1093_v33 = vadd.f32 %v1092_v31, %v1030_v28  ;;  %v964_v34 = vadd.f32 %v1608_v36, %v963_v16  ;;  %v1035_v36 = vmul.f32 %v1620_v61, %v1620_v61 }
 0x165   :  { %v965_v29 = vadd.f32 %v964_v34, %v1617_v54  ;;  %v1094_v38 = vadd.f32 %v1093_v33, %v1031_v11 }
 0x167   :  { %v1095_v41 = vadd.f32 %v1094_v38, %v1032_v37  ;;  %v966_v43 = vadd.f32 %v1614_v48, %v965_v29  ;;  %v1037_v48 = vmul.f32 %v1626_v9, %v1626_v9 }
 0x169   :  { %v967_v42 = vadd.f32 %v966_v43, %v1623_v3  ;;  %v1096_v44 = vadd.f32 %v1095_v41, %v1033_v23 }
 0x16b   :  { %v1097_v46 = vadd.f32 %v1096_v44, %v1034_v21  ;;  %v968_v18 = vadd.f32 %v1620_v61, %v967_v42  ;;  %v1039_v61 = vmul.f32 %v1632_v24, %v1632_v24 }
 0x16d   :  { %v969_v54 = vadd.f32 %v968_v18, %v1629_v15  ;;  %v1098_v51 = vadd.f32 %v1097_v46, %v1035_v36 }
 0x16f   :  { %v1099_v30 = vadd.f32 %v1098_v51, %v1036_v49  ;;  %v970_v52 = vadd.f32 %v1626_v9, %v969_v54  ;;  %v1041_v9 = vmul.f32 %v1638_v39, %v1638_v39 }
 0x171   :  { %v971_v3 = vadd.f32 %v970_v52, %v1635_v32  ;;  %v1100_v25 = vadd.f32 %v1099_v30, %v1037_v48 }
 0x173   :  { %v1101_v57 = vadd.f32 %v1100_v25, %v1038_v53  ;;  %v972_v58 = vadd.f32 %v1632_v24, %v971_v3  ;;  %v1043_v24 = vmul.f32 %v1644_v56, %v1644_v56 }
 0x175   :  { %v973_v15 = vadd.f32 %v972_v58, %v1641_v47  ;;  %v1102_v59 = vadd.f32 %v1101_v57, %v1039_v61 }
 0x177   :  { %v1103_v62 = vadd.f32 %v1102_v59, %v1040_v40  ;;  %v974_v35 = vadd.f32 %v1638_v39, %v973_v15  ;;  %v1045_v39 = vmul.f32 %v1650_v7, %v1650_v7 }
 0x179   :  { %v975_v32 = vadd.f32 %v974_v35, %v1647_v63  ;;  %v1104_v2 = vadd.f32 %v1103_v62, %v1041_v9 }
 0x17b   :  { %v1105_v50 = vadd.f32 %v1104_v2, %v1042_v0  ;;  %v976_v4 = vadd.f32 %v1644_v56, %v975_v32 }
 0x17d   :  { %v977_v47 = vadd.f32 %v976_v4, %v1653_v13  ;;  %v1106_v45 = vadd.f32 %v1105_v50, %v1043_v24 }
 0x17f   :  { %v978_v63 = vadd.f32 %v1650_v7, %v977_v47  ;;  %v1107_v8 = vadd.f32 %v1106_v45, %v1044_v5 }
 0x181   :  { %v1108_v10 = vadd.f32 %v1107_v8, %v1045_v39  ;;  %980 = vst [vmem:[#allocation9] sm:$0xff] %v978_v63 }
 0x182   :  { %1479 = shalt.err (!%p1476_p5)
}
 0x183   :  { %1136 = dma.vmem_to_hbm [thread:$0]  %s1134_s30, 128, %s1767_s3, [#allocation10]   ;;  %1110 = vst [vmem:[#allocation11] sm:$0xff] %v1108_v10 }
 0x184   :  { %s1488_s10 = scalar_lea.vmem %s1144_s6, 128  ;;  %p1493_p7 = scmp.lt.s32.totalorder %s1144_s6, %s1144_s6 }
 0x185   :  { %p1489_p6 = scmp.ne.s32.totalorder %s1144_s6, %s1488_s10  ;;  %p1494_p8 = scmp.lt.s32.totalorder %s1488_s10, %s1488_s10 }
 0x187   :  { %p1495_p9 = por %p1494_p8, %p1493_p7 }
 0x189   :  { %p1496_p10 = pnand %p1495_p9, %p1489_p6 }
 0x18b   :  { %1499 = shalt.err (!%p1496_p10)
}
 0x18c   :  { %1146 = dma.vmem_to_hbm [thread:$0]  %s1144_s6, 128, %s1768_s4, [#allocation10]  }
 0x18d   :  { %1512 = dma.done.wait [#allocation5], 8192  }
 0x18e   :  { %1513 = vsyncadd [#allocation5], 4294959104 }
 0x18f   :  { %1514 = dma.done.wait [#allocation10], 256  }
 0x190   :  { %1515 = vsyncadd [#allocation10], 4294967040 }
 0x191   :  { %1156 = vsyncpa [#allocation4], 1 }
 0x192   :  { %1157 = vsyncpa [#allocation7], 1 }
 0x193   :  { %1158 = vsyncpa [#allocation5], 1 }
 0x194   :  { %1159 = vsyncpa [#allocation10], 1 }

</bundles_post_ra>
